<compile_context>
chip_gen: v7x
topology: tpu7x:2x2x1
jax: 0.10.0
libtpu: 0.0.40
codegen_flags: <defaults>
</compile_context>

<pallas_src>
import math
from functools import partial

import jax
import jax.numpy as jnp
from jax import lax
from jax.experimental import pallas as pl
from jax.experimental.pallas import tpu as pltpu


# ----------------------------- small helpers --------------------------------

def _cdiv(a, b):
    return -(-a // b)


def _round_up(x, m):
    return _cdiv(x, m) * m


def _sublane_align(dtype):
    isz = jnp.dtype(dtype).itemsize
    if isz >= 4:
        return 8
    if isz == 2:
        return 16
    return 32


def _vmem_info():
    """Returns (scoped vmem limit to request, tile budget in bytes)."""
    try:
        cap = int(pltpu.get_tpu_info().vmem_capacity_bytes)
    except Exception:
        cap = 64 * 1024 * 1024  # conservative default = v7x physical VMEM per TC
    vmem_limit = max(32 * 1024 * 1024, int(cap * 0.75))  # ~48 MiB v7x, ~96 MiB v5e/v6e
    tile_budget = int(cap * 0.60)                        # headroom for Mosaic scratch
    return vmem_limit, tile_budget


def _select_caps(B, in_itemsize, out_itemsize, budget):
    """Pick (tm_cap, tn_cap, tk_cap) fitting double-buffered tiles in `budget`."""
    if B <= 512:
        # Small batch: weight-stream bound -> maximize the weight tile (tn*tk).
        candidates = [(512, 1024, 2048), (512, 512, 2048), (512, 512, 1024),
                      (256, 512, 1024), (256, 256, 512), (128, 256, 512),
                      (128, 128, 256)]
    else:
        # Large batch: grow tm so the weight is streamed from HBM fewer times.
        candidates = [(1024, 512, 2048), (1024, 512, 1024), (512, 512, 1024),
                      (512, 256, 1024), (256, 256, 512), (128, 256, 512),
                      (128, 128, 256)]
    for tm, tn, tk in candidates:
        vmem = (2 * tm * tk * in_itemsize        # x tiles   (double-buffered)
                + 2 * tk * tn * in_itemsize      # W tiles   (double-buffered)
                + 2 * tm * tn * out_itemsize     # out tiles (double-buffered)
                + tm * tn * 4                    # f32 accumulator scratch
                + 2 * tn * 4)                    # bias tile
        if vmem <= budget:
            return tm, tn, tk
    return candidates[-1]


def _pick_tile(dim, cap, align):
    """Largest reasonable tile <= cap for a dimension of size `dim`.

    Preference order:
      1. the whole dim (full-extent block is always layout-legal),
      2. an `align`-multiple divisor of dim (no overhanging edge block),
      3. the aligned cap itself (overhanging last block).
    """
    if dim <= cap:
        return dim
    t = (cap // align) * align
    d = t
    while d >= max(align, t // 2):
        if dim % d == 0:
            return d
        d -= align
    return t


# ------------------------------- the kernel ---------------------------------

def _linear_body(x_ref, w_ref, b_ref, o_ref, acc_ref, *, k_rem, has_bias):
    k = pl.program_id(2)
    nk = pl.num_programs(2)

    @pl.when(k == 0)
    def _init():
        acc_ref[...] = jnp.zeros_like(acc_ref)

    x_blk = x_ref[...]
    w_blk = w_ref[...]
    if k_rem:
        # Last K block overhangs in_features: zero the overhang in BOTH
        # operands so OOB garbage (possibly inf/nan) never reaches the
        # accumulator (0 * garbage would still be NaN if only one is masked).
        is_last = k == nk - 1
        col = lax.broadcasted_iota(jnp.int32, x_blk.shape, 1)
        row = lax.broadcasted_iota(jnp.int32, w_blk.shape, 0)
        keep_x = jnp.logical_or(jnp.logical_not(is_last), col < k_rem)
        keep_w = jnp.logical_or(jnp.logical_not(is_last), row < k_rem)
        x_blk = jnp.where(keep_x, x_blk, 0)
        w_blk = jnp.where(keep_w, w_blk, 0)

    # Standard [tm, tk] @ [tk, tn] MXU matmul with f32 accumulation.
    acc_ref[...] += jnp.dot(x_blk, w_blk, preferred_element_type=jnp.float32)

    @pl.when(k == nk - 1)
    def _finish():
        out = acc_ref[...]
        if has_bias:
            out = out + b_ref[...].astype(jnp.float32)
        o_ref[...] = out.astype(o_ref.dtype)


def _make_kernel(k_rem, has_bias):
    if has_bias:
        def kernel(x_ref, w_ref, b_ref, o_ref, acc_ref):
            _linear_body(x_ref, w_ref, b_ref, o_ref, acc_ref,
                         k_rem=k_rem, has_bias=True)
    else:
        def kernel(x_ref, w_ref, o_ref, acc_ref):
            _linear_body(x_ref, w_ref, None, o_ref, acc_ref,
                         k_rem=k_rem, has_bias=False)
    return kernel


# ------------------------------- the wrapper ---------------------------------

def my_linear(x, weight, bias=None, *, use_bf16=True):
    """Pallas implementation of myLinear.forward.

    x:      [B, in_features]
    weight: [out_features, in_features]  (PyTorch Linear layout)
    bias:   [out_features] or None
    use_bf16: feed the MXU bf16 operands (f32 accumulation kept). Set False
              for an exact-f32 path.
    returns [B, out_features] with x's dtype.
    """
    B, y = x.shape
    out_features, in_features = weight.shape
    if y != in_features:
        # Original module prints and returns 0; raising is cleaner under jit.
        raise ValueError(
            f"Wrong Input Features. Please use tensor with {in_features} Input Features"
        )

    out_dtype = x.dtype
    compute_dtype = jnp.bfloat16 if use_bf16 else x.dtype
    in_itemsize = jnp.dtype(compute_dtype).itemsize
    out_itemsize = jnp.dtype(out_dtype).itemsize

    vmem_limit, budget = _vmem_info()
    tm_cap, tn_cap, tk_cap = _select_caps(B, in_itemsize, out_itemsize, budget)

    sub = _sublane_align(compute_dtype)
    tm = _pick_tile(B, tm_cap, sub)
    tn = _pick_tile(out_features, tn_cap, 128)
    tk = _pick_tile(in_features, tk_cap, 128)

    # Megacore: if the parallel grid collapsed to a single block, split N so
    # both TensorCores (v7x) get work.  N-edge blocks are write-masked.
    if _cdiv(B, tm) * _cdiv(out_features, tn) < 2 and out_features >= 256:
        tn = min(tn, _round_up(_cdiv(out_features, 2), 128))

    ni, nj, nk = _cdiv(B, tm), _cdiv(out_features, tn), _cdiv(in_features, tk)
    grid = (ni, nj, nk)  # reduction (K) axis last
    k_rem = (in_features - (nk - 1) * tk) if (in_features % tk) else 0

    # MXU-friendly layout: x[B,K] @ Wt[K,N].  The transpose+cast of the weight
    # is a single fused XLA pass (and halves its HBM footprint in bf16 mode).
    # TODO(synk): for repeated calls with a static weight, precompute/cache Wt
    # once (e.g. store the parameter as [in, out]) instead of per call.
    x_c = x.astype(compute_dtype)
    wt = weight.T.astype(compute_dtype)  # [in_features, out_features]

    x_spec = pl.BlockSpec((tm, tk), lambda i, j, k: (i, k))
    w_spec = pl.BlockSpec((tk, tn), lambda i, j, k: (k, j))
    out_spec = pl.BlockSpec((tm, tn), lambda i, j, k: (i, j))
    scratch = [pltpu.VMEM((tm, tn), jnp.float32)]
    out_shape = jax.ShapeDtypeStruct((B, out_features), out_dtype)

    has_bias = bias is not None
    kernel = _make_kernel(k_rem, has_bias)

    cost = pl.CostEstimate(
        flops=2 * B * in_features * out_features,
        transcendentals=0,
        bytes_accessed=(B * in_features * in_itemsize * nj          # x read per N tile
                        + in_features * out_features * in_itemsize * ni  # W read per M tile
                        + B * out_features * out_itemsize                # output written once
                        + (out_features * 4 if has_bias else 0)),
    )
    compiler_params = pltpu.CompilerParams(
        dimension_semantics=("parallel", "parallel", "arbitrary"),
        vmem_limit_bytes=vmem_limit,
    )

    in_specs = [x_spec, w_spec]
    args = [x_c, wt]
    if has_bias:
        b2d = bias.reshape(1, out_features).astype(jnp.float32)
        in_specs.append(pl.BlockSpec((1, tn), lambda i, j, k: (0, j)))
        args.append(b2d)

    return pl.pallas_call(
        kernel,
        out_shape=out_shape,
        grid_spec=pltpu.PrefetchScalarGridSpec(
            num_scalar_prefetch=0,
            grid=grid,
            in_specs=in_specs,
            out_specs=out_spec,
            scratch_shapes=scratch,
        ),
        compiler_params=compiler_params,
        cost_estimate=cost,
    )(*args)


def init_my_linear_params(key, in_features, out_features, bias=True, dtype=jnp.float32):
    """Matches myLinear.reset_parameters:
    kaiming_uniform_(a=sqrt(5)) on weight -> U(-1/sqrt(fan_in), 1/sqrt(fan_in)),
    bias -> U(-1/sqrt(fan_in), 1/sqrt(fan_in)).
    """
    kw, kb = jax.random.split(key)
    fan_in = in_features
    bound_w = math.sqrt(6.0 / ((1.0 + 5.0) * fan_in))  # = 1/sqrt(fan_in)
    weight = jax.random.uniform(
        kw, (out_features, in_features), dtype, minval=-bound_w, maxval=bound_w
    )
    if bias:
        bound_b = 1.0 / math.sqrt(fan_in)
        b = jax.random.uniform(kb, (out_features,), dtype, minval=-bound_b, maxval=bound_b)
    else:
        b = None
    return weight, b


if __name__ == "__main__":
    key = jax.random.PRNGKey(0)
    k_x, k_p = jax.random.split(key)

    batch = 8
    in_features = 32
    out_features = 64

    x = jax.random.normal(k_x, (batch, in_features), jnp.float32)
    weight, bias = init_my_linear_params(k_p, in_features, out_features, bias=True)

    ref_f32 = x @ weight.T + bias

    # Default (bf16 MXU feed, f32 accumulation): compare against a matched
    # bf16 reference (tight) and the f32 reference (loose).
    out = jax.block_until_ready(my_linear(x, weight, bias))
    assert out.shape == (batch, out_features)
    assert out.dtype == x.dtype
    ref_bf16 = jnp.dot(
        x.astype(jnp.bfloat16), weight.T.astype(jnp.bfloat16),
        preferred_element_type=jnp.float32,
    ) + bias
    assert jnp.allclose(out, ref_bf16, atol=1e-3, rtol=1e-2)
    assert jnp.allclose(out, ref_f32, atol=1e-1, rtol=1e-1)

    # Exact-f32 path.
    out_f32 = jax.block_until_ready(my_linear(x, weight, bias, use_bf16=False))
    assert jnp.allclose(out_f32, ref_f32, atol=1e-5, rtol=1e-5)

    # No-bias path.
    out_nb = jax.block_until_ready(my_linear(x, weight, None, use_bf16=False))
    assert jnp.allclose(out_nb, x @ weight.T, atol=1e-5, rtol=1e-5)

    print("KERNEL_OK")
</pallas_src>

<mosaic_0001>
module attributes {stable_mosaic.version = 11 : i64} {
  func.func @kernel(%arg0: i32, %arg1: i32, %arg2: i32, %arg3: memref<8x32xbf16, #tpu.memory_space<vmem>>, %arg4: memref<32x64xbf16, #tpu.memory_space<vmem>>, %arg5: memref<1x64xf32, #tpu.memory_space<vmem>>, %arg6: memref<8x64xf32, #tpu.memory_space<vmem>>, %arg7: memref<8x64xf32, #tpu.memory_space<vmem>>) attributes {dimension_semantics = [#tpu.dimension_semantics<parallel>, #tpu.dimension_semantics<parallel>, #tpu.dimension_semantics<arbitrary>], iteration_bounds = array<i64: 1, 1, 1>, scalar_prefetch = 0 : i64, scratch_operands = 1 : i64, tpu.core_type = #tpu.core_type<tc>, window_params = [{transform_indices = @transform_0, window_bounds = array<i64: 8, 32>}, {transform_indices = @transform_1, window_bounds = array<i64: 32, 64>}, {transform_indices = @transform_2, window_bounds = array<i64: 1, 64>}, {transform_indices = @transform_3, window_bounds = array<i64: 8, 64>}]} {
    %c0_i32 = arith.constant 0 : i32
    %0 = arith.cmpi eq, %arg2, %c0_i32 : i32
    %1 = arith.extui %0 : i1 to i32
    %c0_i32_0 = arith.constant 0 : i32
    %2 = arith.cmpi ne, %1, %c0_i32_0 : i32
    scf.if %2 {
      %cst_10 = arith.constant 0.000000e+00 : f32
      %12 = vector.broadcast %cst_10 : f32 to vector<8x64xf32>
      %c0_11 = arith.constant 0 : index
      %c0_12 = arith.constant 0 : index
      %13 = vector.load %arg7[%c0_11, %c0_12] : memref<8x64xf32, #tpu.memory_space<vmem>>, vector<8x64xf32>
      tpu.vector_store %arg7[%c0_11, %c0_12], %12 {strides = array<i32>} : memref<8x64xf32, #tpu.memory_space<vmem>>, vector<8x64xf32>,
    } else {
    }
    %c0 = arith.constant 0 : index
    %c0_1 = arith.constant 0 : index
    %3 = vector.load %arg3[%c0, %c0_1] : memref<8x32xbf16, #tpu.memory_space<vmem>>, vector<8x32xbf16>
    %c0_2 = arith.constant 0 : index
    %c0_3 = arith.constant 0 : index
    %4 = vector.load %arg4[%c0_2, %c0_3] : memref<32x64xbf16, #tpu.memory_space<vmem>>, vector<32x64xbf16>
    %c0_4 = arith.constant 0 : index
    %c0_5 = arith.constant 0 : index
    %5 = vector.load %arg7[%c0_4, %c0_5] : memref<8x64xf32, #tpu.memory_space<vmem>>, vector<8x64xf32>
    %cst = arith.constant dense<0.000000e+00> : vector<8x64xf32>
    %6 = tpu.matmul %3, %4, %cst {dimension_numbers = #tpu.dot_dimension_numbers<[1], [0], [0], [1], [0, 0, 1, 1], [], []>} : vector<8x32xbf16>, vector<32x64xbf16>, vector<8x64xf32> -> vector<8x64xf32>
    %7 = arith.addf %5, %6 : vector<8x64xf32>
    %c0_6 = arith.constant 0 : index
    %c0_7 = arith.constant 0 : index
    %8 = vector.load %arg7[%c0_6, %c0_7] : memref<8x64xf32, #tpu.memory_space<vmem>>, vector<8x64xf32>
    tpu.vector_store %arg7[%c0_6, %c0_7], %7 {strides = array<i32>} : memref<8x64xf32, #tpu.memory_space<vmem>>, vector<8x64xf32>,
    %c0_i32_8 = arith.constant 0 : i32
    %9 = arith.cmpi eq, %arg2, %c0_i32_8 : i32
    %10 = arith.extui %9 : i1 to i32
    %c0_i32_9 = arith.constant 0 : i32
    %11 = arith.cmpi ne, %10, %c0_i32_9 : i32
    scf.if %11 {
      %c0_10 = arith.constant 0 : index
      %c0_11 = arith.constant 0 : index
      %12 = vector.load %arg7[%c0_10, %c0_11] : memref<8x64xf32, #tpu.memory_space<vmem>>, vector<8x64xf32>
      %c0_12 = arith.constant 0 : index
      %c0_13 = arith.constant 0 : index
      %13 = vector.load %arg5[%c0_12, %c0_13] : memref<1x64xf32, #tpu.memory_space<vmem>>, vector<1x64xf32>
      %14 = vector.broadcast %13 : vector<1x64xf32> to vector<8x64xf32>
      %15 = arith.addf %12, %14 : vector<8x64xf32>
      %c0_14 = arith.constant 0 : index
      %c0_15 = arith.constant 0 : index
      %16 = vector.load %arg6[%c0_14, %c0_15] : memref<8x64xf32, #tpu.memory_space<vmem>>, vector<8x64xf32>
      tpu.vector_store %arg6[%c0_14, %c0_15], %15 {strides = array<i32>} : memref<8x64xf32, #tpu.memory_space<vmem>>, vector<8x64xf32>,
    } else {
    }
    return
  }
  func.func @transform_0(%arg0: i32, %arg1: i32, %arg2: i32) -> (i32, i32) {
    %c0_i32 = arith.constant 0 : i32
    return %arg0, %arg2 : i32, i32
  }
  func.func @transform_1(%arg0: i32, %arg1: i32, %arg2: i32) -> (i32, i32) {
    %c0_i32 = arith.constant 0 : i32
    return %arg2, %arg1 : i32, i32
  }
  func.func @transform_2(%arg0: i32, %arg1: i32, %arg2: i32) -> (i32, i32) {
    %c0_i32 = arith.constant 0 : i32
    %c0_i32_0 = arith.constant 0 : i32
    return %c0_i32, %arg1 : i32, i32
  }
  func.func @transform_3(%arg0: i32, %arg1: i32, %arg2: i32) -> (i32, i32) {
    %c0_i32 = arith.constant 0 : i32
    return %arg0, %arg1 : i32, i32
  }
}

</mosaic_0001>

<bundles_post_ra>
// kernel: tpu_custom_call.1
= control target key start
LH: loop header
LB: loop body
LE: loop exit
PB: predicated region body
PF: predicated region fallthrough
CT: control target
= control target key end

     0   :  { %8 = vsyncpa [#allocation4], 0  ;;  %s314_s0 = inlined_call_operand.hbm [shape: bf16[8,32], index: 0, kind: input, shape index: {}]   ;;  %s315_s1 = inlined_call_operand.hbm [shape: bf16[32,64], index: 1, kind: input, shape index: {}]   ;;  %s316_s2 = inlined_call_operand.vmem [shape: f32[1,64], index: 2, kind: input, shape index: {}]   ;;  %s317_s3 = inlined_call_operand.hbm [shape: f32[8,64], index: 3, kind: output, shape index: {}]  }
   0x1   :  { %9 = vsyncpa [#allocation7], 0 }
   0x2   :  { %10 = vsyncpa [#allocation5], 0  ;;  %s238_s12 = smov [#allocation3]   ;;  %s239_s14 = smov [#allocation6]  }
   0x3   :  { %s17_s13 = sshll.u32 %s238_s12, 4  ;;  %s26_s15 = sshll.u32 %s239_s14, 4  ;;  %s18_s13 = int_to_ptr.vmem [resolvable:$true] %s17_s13  ;;  %s265_s15 = int_to_ptr.vmem [resolvable:$true] %s26_s15 }
   0x4   :  { %s166_s18 = scalar_lea.hbm %s314_s0, 64 }
   0x5   :  { %p167_p0 = scmp.ne.s32.totalorder %s314_s0, %s166_s18  ;;  %p170_p1 = scmp.lt.u32.totalorder %s166_s18, %s314_s0 }
   0x7   :  { %p172_p2 = pnand %p170_p1, %p167_p0 }
   0x9   :  { %175 = shalt.err (!%p172_p2)
}
   0xa   :  { %s176_s23 = scalar_lea.vmem %s18_s13, 64  ;;  %p181_p4 = scmp.lt.s32.totalorder %s18_s13, %s18_s13 }
   0xb   :  { %p177_p3 = scmp.ne.s32.totalorder %s18_s13, %s176_s23  ;;  %p182_p5 = scmp.lt.s32.totalorder %s176_s23, %s176_s23 }
   0xd   :  { %p183_p6 = por %p182_p5, %p181_p4 }
   0xf   :  { %p184_p7 = pnand %p183_p6, %p177_p3 }
  0x11   :  { %187 = shalt.err (!%p184_p7)
}
  0x12   :  { %20 = dma.hbm_to_vmem [thread:$0]  %s314_s0, 64, %s18_s13, [#allocation4]  }
  0x13   :  { %s188_s28 = scalar_lea.hbm %s315_s1, 256 }
  0x14   :  { %p189_p8 = scmp.ne.s32.totalorder %s315_s1, %s188_s28  ;;  %p192_p9 = scmp.lt.u32.totalorder %s188_s28, %s315_s1 }
  0x16   :  { %p194_p10 = pnand %p192_p9, %p189_p8 }
  0x18   :  { %197 = shalt.err (!%p194_p10)
}
  0x19   :  { %s198_s6 = scalar_lea.vmem %s265_s15, 256  ;;  %p203_p12 = scmp.lt.s32.totalorder %s265_s15, %s265_s15 }
  0x1a   :  { %p199_p11 = scmp.ne.s32.totalorder %s265_s15, %s198_s6  ;;  %p204_p13 = scmp.lt.s32.totalorder %s198_s6, %s198_s6 }
  0x1c   :  { %p205_p0 = por %p204_p13, %p203_p12 }
  0x1e   :  { %p206_p1 = pnand %p205_p0, %p199_p11 }
  0x20   :  { %209 = shalt.err (!%p206_p1)
}
  0x21   :  { %s240_s0 = smov 64   ;;  %s241_s7 = smov 4  }
  0x22   :  { %32 = dma.hbm_to_vmem [thread:$0]  %s315_s1, 256, %s265_s15, [#allocation7], %s240_s0, %s240_s0, %s241_s7  }
  0x23   :  { %232 = dma.done.wait [#allocation4], 64  }
  0x24   :  { %233 = vsyncadd [#allocation4], 4294967232 }
  0x25   :  { %234 = dma.done.wait [#allocation7], 256  }
  0x26   :  { %235 = vsyncadd [#allocation7], 4294967040  ;;  %vm46_vm0 = vcmask 523264   ;;  %v242_v0 = vmov 0.0   ;;  %vm243_vm1 = vmmov 0   ;;  %v164_v1 = vld [vmem:[#allocation6] sm:$0xff]  }
  0x27   :  { %149 = vmatprep.subr.bf16.mxu0 %v242_v0  ;;  %153 = vmatprep.mubr.msk.bf16.mxu0 %vm243_vm1, %v242_v0  ;;  %47 = vst.msk [vmem:[#allocation2] sm:$0xff] %vm46_vm0, %v242_v0  ;;  %v165_v2 = vld [vmem:[#allocation6 + $0x8] sm:$0xff]   ;;  %v48_v3 = vld [vmem:[#allocation3] sm:$0xf]  ;;  %vm66_vm2 = vcmask 261120   ;;  %s244_s11 = smov [#allocation8]  }
  0x28   :  { %150 = vmatpush3.bf16.msra.mxu0 %v164_v1  ;;  %v145_v10 = vld [vmem:[%s316_s2] ss:$0 sm:$0xff]  ;;  %s132_s12 = sshll.u32 %s244_s11, 4  ;;  %s133_s12 = int_to_ptr.vmem [resolvable:$true] %s132_s12 }
  0x29   :  { %151 = vmatprep.subr.bf16.mxu0 %v242_v0  ;;  %s210_s13 = scalar_lea.vmem %s133_s12, 128  ;;  %p215_p3 = scmp.lt.s32.totalorder %s133_s12, %s133_s12 }
  0x2a   :  { %p211_p2 = scmp.ne.s32.totalorder %s133_s12, %s210_s13  ;;  %p216_p4 = scmp.lt.s32.totalorder %s210_s13, %s210_s13 }
  0x2c   :  { %152 = vmatpush3.bf16.msra.mxu0 %v165_v2  ;;  %p217_p5 = por %p216_p4, %p215_p3 }
  0x2e   :  { %v53_v4 = vld [vmem:[#allocation2] sm:$0xff]  ;;  %p218_p6 = pnand %p217_p5, %p211_p2 }
  0x2f   :  { %154 = vmatmul.mubr.msk.bf16.vlgmr.msra.gmra.mrb[0].mxu0 %vm66_vm2, %v48_v3 }
 0x102   :  { %v104_v5 = vpop.f32.mrb[0].mxu0 }
 0x103   :  { %v110_v6 = vadd.f32 %v104_v5, %v53_v4  ;;  %v155_v7 = vpop.f32.mrb[1].mxu0 }
 0x104   :  { %v107_v8 = vpop.f32.mrb[2].mxu0 }
 0x105   :  { %112 = vst.msk [vmem:[#allocation2] sm:$0xff] %vm46_vm0, %v110_v6  ;;  %v156_v9 = vpop.f32.mrb[3].mxu0 }
 0x10c   :  { %v116_v11 = vld [vmem:[#allocation2] sm:$0xff] }
 0x10d   :  { %v124_v12 = vadd.f32 %v145_v10, %v116_v11 }
 0x10f   :  { %125 = vst.msk [vmem:[#allocation8] sm:$0xff] %vm46_vm0, %v124_v12 }
 0x110   :  { %221 = shalt.err (!%p218_p6)
}
 0x111   :  { %s222_s16 = scalar_lea.hbm %s317_s3, 128 }
 0x112   :  { %p223_p7 = scmp.ne.s32.totalorder %s317_s3, %s222_s16  ;;  %p226_p8 = scmp.lt.u32.totalorder %s222_s16, %s317_s3 }
 0x114   :  { %p228_p9 = pnand %p226_p8, %p223_p7 }
 0x116   :  { %231 = shalt.err (!%p228_p9)
}
 0x117   :  { %135 = dma.vmem_to_hbm [thread:$0]  %s133_s12, 128, %s317_s3, [#allocation5]  }
 0x118   :  { %236 = dma.done.wait [#allocation5], 128  }
 0x119   :  { %237 = vsyncadd [#allocation5], 4294967168 }
 0x11a   :  { %139 = vsyncpa [#allocation4], 1 }
 0x11b   :  { %140 = vsyncpa [#allocation7], 1 }
 0x11c   :  { %141 = vsyncpa [#allocation5], 1 }

</bundles_post_ra>
